<compile_context>
chip_gen: v6e
topology: v6e:2x2x1
jax: 0.10.0
libtpu: 0.0.40
codegen_flags: <defaults>
</compile_context>

<pallas_src>
import functools

import jax
import jax.numpy as jnp
from jax.experimental import pallas as pl
from jax.experimental.pallas import tpu as pltpu

PAD = 0
NEG = -1e9  # large finite negative in place of -inf


# ----------------------------------------------------------------------------
# Fused decoder kernel: attention + FFN + causal conv + previous-user mask.
# One grid step = one batch element.
# ----------------------------------------------------------------------------
def decoder_kernel(seq_row_ref, seq_col_ref, x_ref,
                   wqkv_ref, wo_ref, ln1g_ref, ln1b_ref,
                   w1_ref, b1_ref, w2_ref, b2_ref,
                   ln2g_ref, ln2b_ref,
                   wconv_ref, bconv_ref,
                   out_ref, *, d_model, d_k, kernel_size, user_size, eps):
    L = x_ref.shape[1]
    D = d_model
    bf16 = jnp.bfloat16

    x = x_ref[0]                                     # (L, D) f32 embedded input
    xb = x.astype(bf16)

    # --- fused QKV projection: one MXU pass, bf16 operands, f32 accumulation --
    qkv = jnp.dot(xb, wqkv_ref[...], preferred_element_type=jnp.float32)  # (L, 3D)
    q = qkv[:, :D]
    k = qkv[:, D:2 * D]
    v = qkv[:, 2 * D:]

    # --- scaled dot-product attention, mask built in-kernel --------------------
    s = jax.lax.dot_general(q.astype(bf16), k.astype(bf16),
                            (((1,), (1,)), ((), ())),
                            preferred_element_type=jnp.float32)           # (L, L)
    s = s * (1.0 / (d_k ** 0.5))

    row = jax.lax.broadcasted_iota(jnp.int32, (L, L), 0)
    col = jax.lax.broadcasted_iota(jnp.int32, (L, L), 1)
    pad_k = seq_row_ref[0] == PAD                    # (1, L): key is padding
    masked = jnp.logical_or(col > row, pad_k)        # subsequent | padding
    s = jnp.where(masked, NEG, s)

    s = s - jnp.max(s, axis=-1, keepdims=True)
    p = jnp.exp(s)
    p = p * pl.reciprocal(jnp.sum(p, axis=-1, keepdims=True), approx=True)

    o = jnp.dot(p.astype(bf16), v.astype(bf16), preferred_element_type=jnp.float32)
    o = jnp.dot(o.astype(bf16), wo_ref[...], preferred_element_type=jnp.float32)

    # --- residual + LayerNorm 1 (f32) ------------------------------------------
    h = o + x
    mu = jnp.mean(h, axis=-1, keepdims=True)
    var = jnp.mean((h - mu) ** 2, axis=-1, keepdims=True)
    h = (h - mu) * jax.lax.rsqrt(var + eps) * ln1g_ref[...] + ln1b_ref[...]

    # --- position-wise FFN ------------------------------------------------------
    f = jnp.dot(h.astype(bf16), w1_ref[...],
                preferred_element_type=jnp.float32) + b1_ref[...]
    f = jnp.maximum(f, 0.0)
    f = jnp.dot(f.astype(bf16), w2_ref[...],
                preferred_element_type=jnp.float32) + b2_ref[...]

    # --- residual + LayerNorm 2 (f32) ------------------------------------------
    h2 = f + h
    mu2 = jnp.mean(h2, axis=-1, keepdims=True)
    var2 = jnp.mean((h2 - mu2) ** 2, axis=-1, keepdims=True)
    hout = (h2 - mu2) * jax.lax.rsqrt(var2 + eps) * ln2g_ref[...] + ln2b_ref[...]
    hb = hout.astype(bf16)                           # (L, D)

    # --- previous-user mask built in-kernel -------------------------------------
    # seen[t, u] = user u appears in seq[0..t]  (tril(ones) @ one-hot on the MXU)
    u_iota = jax.lax.broadcasted_iota(jnp.int32, (L, user_size), 1)
    onehot = (seq_col_ref[0] == u_iota).astype(bf16)               # (L, U)
    tril = (col <= row).astype(bf16)                               # (L, L)
    counts = jnp.dot(tril, onehot, preferred_element_type=jnp.float32)
    seen = jnp.logical_or(counts > 0.5, u_iota == PAD)             # PAD always masked
    acc = jnp.where(seen, NEG, 0.0) + bconv_ref[...]               # (L, U) f32

    # --- causal Conv1d as K shifted matmuls (no im2col) -------------------------
    # out[t] += h[t - (K-1-j)] @ W[j]; the row shift is a (L,L) selection matmul.
    for j in range(kernel_size):
        shift = kernel_size - 1 - j
        if shift == 0:
            hj = hb
        else:
            shift_mat = (row - col == shift).astype(bf16)          # (L, L)
            hj = jnp.dot(shift_mat, hb,
                         preferred_element_type=jnp.float32).astype(bf16)
        acc = acc + jnp.dot(hj, wconv_ref[j], preferred_element_type=jnp.float32)

    out_ref[0] = acc


def run_decoder(tgt_seq, dec_input, p, user_size):
    B, L = tgt_seq.shape
    D = dec_input.shape[-1]
    Dh = p["w1"].shape[1]
    K = p["w_conv"].shape[0]

    seq_row = tgt_seq.astype(jnp.int32)[:, None, :]   # (B, 1, L) for pad mask
    seq_col = tgt_seq.astype(jnp.int32)[:, :, None]   # (B, L, 1) for prev-user mask

    def rep(shape):  # weights/biases: same block for every grid step
        if len(shape) == 2:
            return pl.BlockSpec(shape, lambda b: (0, 0))
        return pl.BlockSpec(shape, lambda b: (0, 0, 0))

    kernel = functools.partial(decoder_kernel, d_model=D, d_k=D,
                               kernel_size=K, user_size=user_size, eps=1e-5)

    return pl.pallas_call(
        kernel,
        out_shape=jax.ShapeDtypeStruct((B, L, user_size), jnp.float32),
        grid=(B,),
        in_specs=[
            pl.BlockSpec((1, 1, L), lambda b: (b, 0, 0)),   # seq_row (int32)
            pl.BlockSpec((1, L, 1), lambda b: (b, 0, 0)),   # seq_col (int32)
            pl.BlockSpec((1, L, D), lambda b: (b, 0, 0)),   # embedded input
            rep((D, 3 * D)), rep((D, D)),                   # wqkv, wo      (bf16)
            rep((1, D)), rep((1, D)),                       # ln1 gamma/beta
            rep((D, Dh)), rep((1, Dh)),                     # w1, b1
            rep((Dh, D)), rep((1, D)),                      # w2, b2
            rep((1, D)), rep((1, D)),                       # ln2 gamma/beta
            rep((K, D, user_size)), rep((1, user_size)),    # conv weight/bias
        ],
        out_specs=pl.BlockSpec((1, L, user_size), lambda b: (b, 0, 0)),
        compiler_params=pltpu.CompilerParams(dimension_semantics=("parallel",)),
    )(seq_row, seq_col, dec_input,
      p["wqkv"], p["wo"], p["ln1_g"], p["ln1_b"],
      p["w1"], p["b1"], p["w2"], p["b2"], p["ln2_g"], p["ln2_b"],
      p["w_conv"], p["b_conv"])


# ----------------------------------------------------------------------------
# Parameter init (deterministic, synthetic weights).
# ----------------------------------------------------------------------------
def init_params(key, user_size, d_model, d_inner, kernel_size=3):
    ks = jax.random.split(key, 10)
    std = 0.05
    bf16 = jnp.bfloat16

    emb = jax.random.normal(ks[0], (user_size, d_model), jnp.float32) * std
    emb = emb.at[PAD].set(0.0)                      # padding_idx = PAD

    wq = jax.random.normal(ks[1], (d_model, d_model), jnp.float32) * std
    wk = jax.random.normal(ks[2], (d_model, d_model), jnp.float32) * std
    wv = jax.random.normal(ks[3], (d_model, d_model), jnp.float32) * std
    wqkv = jnp.concatenate([wq, wk, wv], axis=1).astype(bf16)      # (D, 3D)
    wo = (jax.random.normal(ks[4], (d_model, d_model), jnp.float32) * std).astype(bf16)

    w1 = (jax.random.normal(ks[5], (d_model, d_inner), jnp.float32) * std).astype(bf16)
    w2 = (jax.random.normal(ks[6], (d_inner, d_model), jnp.float32) * std).astype(bf16)

    # Conv taps stored as (K, D, U) = w[j, c, u]. NOTE: real PyTorch Conv1d
    # weights are (U, D, K); transpose(2, 1, 0) before use if loading them.
    w_conv = (jax.random.normal(ks[7], (kernel_size, d_model, user_size),
                                jnp.float32) * std).astype(bf16)
    b_conv = jax.random.normal(ks[8], (1, user_size), jnp.float32) * std

    return {
        "emb": emb,
        "wqkv": wqkv, "wo": wo,
        "ln1_g": jnp.ones((1, d_model), jnp.float32),
        "ln1_b": jnp.zeros((1, d_model), jnp.float32),
        "w1": w1, "b1": jnp.zeros((1, d_inner), jnp.float32),
        "w2": w2, "b2": jnp.zeros((1, d_model), jnp.float32),
        "ln2_g": jnp.ones((1, d_model), jnp.float32),
        "ln2_b": jnp.zeros((1, d_model), jnp.float32),
        "w_conv": w_conv, "b_conv": b_conv,
    }


# ----------------------------------------------------------------------------
# Full forward pass: embedding gather stays in XLA, everything else is Pallas.
# ----------------------------------------------------------------------------
def decoder_forward(tgt_seq_full, params, user_size):
    # generate=False -> drop last token
    tgt_seq = tgt_seq_full[:, :-1]
    # nn.Embedding lookup (XLA gather); its output is read exactly once by the kernel.
    dec_input = jnp.take(params["emb"], tgt_seq, axis=0).astype(jnp.float32)
    logits = run_decoder(tgt_seq, dec_input, params, user_size)    # (B, L, U)
    return logits.reshape(-1, user_size)                           # (B*L, U)


# ----------------------------------------------------------------------------
if __name__ == "__main__":
    key = jax.random.PRNGKey(0)

    B, L_full = 2, 8
    d_model = 32
    d_inner = 32
    user_size = 64

    params = init_params(key, user_size, d_model, d_inner, kernel_size=3)

    # user ids in [1, user_size): no PAD tokens (same degenerate case the
    # PyTorch reference would hit with fully-masked attention rows).
    tgt_seq = jax.random.randint(jax.random.fold_in(key, 123),
                                 (B, L_full), 1, user_size, dtype=jnp.int32)

    out = decoder_forward(tgt_seq, params, user_size)
    jax.block_until_ready(out)

    assert out.shape == (B * (L_full - 1), user_size)
    assert bool(jnp.all(jnp.isfinite(out)))   # masks use -1e9, so no inf/NaN
    print("KERNEL_OK")
</pallas_src>

<mosaic_0001>
module attributes {stable_mosaic.version = 11 : i64} {
  func.func @decoder_kernel(%arg0: i32, %arg1: memref<1x1x7xi32, #tpu.memory_space<vmem>>, %arg2: memref<1x7x1xi32, #tpu.memory_space<vmem>>, %arg3: memref<1x7x32xf32, #tpu.memory_space<vmem>>, %arg4: memref<32x96xbf16, #tpu.memory_space<vmem>>, %arg5: memref<32x32xbf16, #tpu.memory_space<vmem>>, %arg6: memref<1x32xf32, #tpu.memory_space<vmem>>, %arg7: memref<1x32xf32, #tpu.memory_space<vmem>>, %arg8: memref<32x32xbf16, #tpu.memory_space<vmem>>, %arg9: memref<1x32xf32, #tpu.memory_space<vmem>>, %arg10: memref<32x32xbf16, #tpu.memory_space<vmem>>, %arg11: memref<1x32xf32, #tpu.memory_space<vmem>>, %arg12: memref<1x32xf32, #tpu.memory_space<vmem>>, %arg13: memref<1x32xf32, #tpu.memory_space<vmem>>, %arg14: memref<3x32x64xbf16, #tpu.memory_space<vmem>>, %arg15: memref<1x64xf32, #tpu.memory_space<vmem>>, %arg16: memref<1x7x64xf32, #tpu.memory_space<vmem>>) attributes {dimension_semantics = [#tpu.dimension_semantics<parallel>], iteration_bounds = array<i64: 2>, scalar_prefetch = 0 : i64, scratch_operands = 0 : i64, tpu.core_type = #tpu.core_type<tc>, window_params = [{transform_indices = @transform_0, window_bounds = array<i64: 1, 1, 7>}, {transform_indices = @transform_1, window_bounds = array<i64: 1, 7, 1>}, {transform_indices = @transform_2, window_bounds = array<i64: 1, 7, 32>}, {pipeline_mode = #tpu.pipeline_mode<synchronous>, transform_indices = @transform_3, window_bounds = array<i64: 32, 96>}, {pipeline_mode = #tpu.pipeline_mode<synchronous>, transform_indices = @transform_4, window_bounds = array<i64: 32, 32>}, {pipeline_mode = #tpu.pipeline_mode<synchronous>, transform_indices = @transform_5, window_bounds = array<i64: 1, 32>}, {pipeline_mode = #tpu.pipeline_mode<synchronous>, transform_indices = @transform_6, window_bounds = array<i64: 1, 32>}, {pipeline_mode = #tpu.pipeline_mode<synchronous>, transform_indices = @transform_7, window_bounds = array<i64: 32, 32>}, {pipeline_mode = #tpu.pipeline_mode<synchronous>, transform_indices = @transform_8, window_bounds = array<i64: 1, 32>}, {pipeline_mode = #tpu.pipeline_mode<synchronous>, transform_indices = @transform_9, window_bounds = array<i64: 32, 32>}, {pipeline_mode = #tpu.pipeline_mode<synchronous>, transform_indices = @transform_10, window_bounds = array<i64: 1, 32>}, {pipeline_mode = #tpu.pipeline_mode<synchronous>, transform_indices = @transform_11, window_bounds = array<i64: 1, 32>}, {pipeline_mode = #tpu.pipeline_mode<synchronous>, transform_indices = @transform_12, window_bounds = array<i64: 1, 32>}, {pipeline_mode = #tpu.pipeline_mode<synchronous>, transform_indices = @transform_13, window_bounds = array<i64: 3, 32, 64>}, {pipeline_mode = #tpu.pipeline_mode<synchronous>, transform_indices = @transform_14, window_bounds = array<i64: 1, 64>}, {transform_indices = @transform_15, window_bounds = array<i64: 1, 7, 64>}]} {
    %c0 = arith.constant 0 : index
    %c0_0 = arith.constant 0 : index
    %c0_1 = arith.constant 0 : index
    %0 = vector.load %arg3[%c0, %c0_0, %c0_1] : memref<1x7x32xf32, #tpu.memory_space<vmem>>, vector<1x7x32xf32>
    %1 = vector.shape_cast %0 : vector<1x7x32xf32> to vector<7x32xf32>
    %2 = arith.truncf %1 : vector<7x32xf32> to vector<7x32xbf16>
    %c0_2 = arith.constant 0 : index
    %c0_3 = arith.constant 0 : index
    %3 = vector.load %arg4[%c0_2, %c0_3] : memref<32x96xbf16, #tpu.memory_space<vmem>>, vector<32x96xbf16>
    %cst = arith.constant dense<0.000000e+00> : vector<7x96xf32>
    %4 = tpu.matmul %2, %3, %cst {dimension_numbers = #tpu.dot_dimension_numbers<[1], [0], [0], [1], [0, 0, 1, 1], [], []>} : vector<7x32xbf16>, vector<32x96xbf16>, vector<7x96xf32> -> vector<7x96xf32>
    %5 = vector.extract_strided_slice %4 {offsets = [0, 0], sizes = [7, 32], strides = [1, 1]} : vector<7x96xf32> to vector<7x32xf32>
    %6 = vector.extract_strided_slice %4 {offsets = [0, 32], sizes = [7, 32], strides = [1, 1]} : vector<7x96xf32> to vector<7x32xf32>
    %7 = vector.extract_strided_slice %4 {offsets = [0, 64], sizes = [7, 32], strides = [1, 1]} : vector<7x96xf32> to vector<7x32xf32>
    %8 = arith.truncf %5 : vector<7x32xf32> to vector<7x32xbf16>
    %9 = arith.truncf %6 : vector<7x32xf32> to vector<7x32xbf16>
    %cst_4 = arith.constant dense<0.000000e+00> : vector<7x7xf32>
    %10 = tpu.matmul %8, %9, %cst_4 {dimension_numbers = #tpu.dot_dimension_numbers<[1], [1], [0], [0], [0, 0, 1, 0], [], []>} : vector<7x32xbf16>, vector<7x32xbf16>, vector<7x7xf32> -> vector<7x7xf32>
    %cst_5 = arith.constant 0.176776692 : f32
    %11 = vector.broadcast %cst_5 : f32 to vector<7x7xf32>
    %12 = arith.mulf %10, %11 : vector<7x7xf32>
    %13 = tpu.iota {dimensions = array<i32: 0>} : vector<7x7xi32>
    %14 = tpu.iota {dimensions = array<i32: 1>} : vector<7x7xi32>
    %c0_6 = arith.constant 0 : index
    %c0_7 = arith.constant 0 : index
    %c0_8 = arith.constant 0 : index
    %15 = vector.load %arg1[%c0_6, %c0_7, %c0_8] : memref<1x1x7xi32, #tpu.memory_space<vmem>>, vector<1x1x7xi32>
    %16 = vector.shape_cast %15 : vector<1x1x7xi32> to vector<1x7xi32>
    %c0_i32 = arith.constant 0 : i32
    %17 = vector.broadcast %c0_i32 : i32 to vector<1x7xi32>
    %18 = arith.cmpi eq, %16, %17 : vector<1x7xi32>
    %19 = arith.cmpi sgt, %14, %13 : vector<7x7xi32>
    %20 = vector.broadcast %18 : vector<1x7xi1> to vector<7x7xi1>
    %21 = arith.ori %19, %20 : vector<7x7xi1>
    %cst_9 = arith.constant -1.000000e+09 : f32
    %22 = vector.broadcast %cst_9 : f32 to vector<7x7xf32>
    %23 = arith.select %21, %22, %12 : vector<7x7xi1>, vector<7x7xf32>
    %cst_10 = arith.constant dense<0xFF800000> : vector<7xf32>
    %24 = vector.multi_reduction <maximumf>, %23, %cst_10 [1] : vector<7x7xf32> to vector<7xf32>
    %25 = vector.shape_cast %24 : vector<7xf32> to vector<7x1xf32>
    %26 = vector.broadcast %25 : vector<7x1xf32> to vector<7x7xf32>
    %27 = arith.subf %23, %26 : vector<7x7xf32>
    %28 = math.exp %27 : vector<7x7xf32>
    %cst_11 = arith.constant dense<0.000000e+00> : vector<7xf32>
    %29 = vector.multi_reduction <add>, %28, %cst_11 [1] : vector<7x7xf32> to vector<7xf32>
    %30 = vector.shape_cast %29 : vector<7xf32> to vector<7x1xf32>
    %31 = tpu.reciprocal %30 {approx = true} : vector<7x1xf32> -> vector<7x1xf32>
    %32 = vector.broadcast %31 : vector<7x1xf32> to vector<7x7xf32>
    %33 = arith.mulf %28, %32 : vector<7x7xf32>
    %34 = arith.truncf %33 : vector<7x7xf32> to vector<7x7xbf16>
    %35 = arith.truncf %7 : vector<7x32xf32> to vector<7x32xbf16>
    %cst_12 = arith.constant dense<0.000000e+00> : vector<7x32xf32>
    %36 = tpu.matmul %34, %35, %cst_12 {dimension_numbers = #tpu.dot_dimension_numbers<[1], [0], [0], [1], [0, 0, 1, 1], [], []>} : vector<7x7xbf16>, vector<7x32xbf16>, vector<7x32xf32> -> vector<7x32xf32>
    %37 = arith.truncf %36 : vector<7x32xf32> to vector<7x32xbf16>
    %c0_13 = arith.constant 0 : index
    %c0_14 = arith.constant 0 : index
    %38 = vector.load %arg5[%c0_13, %c0_14] : memref<32x32xbf16, #tpu.memory_space<vmem>>, vector<32x32xbf16>
    %cst_15 = arith.constant dense<0.000000e+00> : vector<7x32xf32>
    %39 = tpu.matmul %37, %38, %cst_15 {dimension_numbers = #tpu.dot_dimension_numbers<[1], [0], [0], [1], [0, 0, 1, 1], [], []>} : vector<7x32xbf16>, vector<32x32xbf16>, vector<7x32xf32> -> vector<7x32xf32>
    %40 = arith.addf %39, %1 : vector<7x32xf32>
    %cst_16 = arith.constant dense<0.000000e+00> : vector<7xf32>
    %41 = vector.multi_reduction <add>, %40, %cst_16 [1] : vector<7x32xf32> to vector<7xf32>
    %42 = vector.shape_cast %41 : vector<7xf32> to vector<7x1xf32>
    %cst_17 = arith.constant 3.200000e+01 : f32
    %43 = vector.broadcast %cst_17 : f32 to vector<7x1xf32>
    %44 = arith.divf %42, %43 : vector<7x1xf32>
    %45 = vector.broadcast %44 : vector<7x1xf32> to vector<7x32xf32>
    %46 = arith.subf %40, %45 : vector<7x32xf32>
    %47 = arith.mulf %46, %46 : vector<7x32xf32>
    %cst_18 = arith.constant dense<0.000000e+00> : vector<7xf32>
    %48 = vector.multi_reduction <add>, %47, %cst_18 [1] : vector<7x32xf32> to vector<7xf32>
    %49 = vector.shape_cast %48 : vector<7xf32> to vector<7x1xf32>
    %cst_19 = arith.constant 3.200000e+01 : f32
    %50 = vector.broadcast %cst_19 : f32 to vector<7x1xf32>
    %51 = arith.divf %49, %50 : vector<7x1xf32>
    %52 = vector.broadcast %44 : vector<7x1xf32> to vector<7x32xf32>
    %53 = arith.subf %40, %52 : vector<7x32xf32>
    %cst_20 = arith.constant 9.99999974E-6 : f32
    %54 = vector.broadcast %cst_20 : f32 to vector<7x1xf32>
    %55 = arith.addf %51, %54 : vector<7x1xf32>
    %56 = math.rsqrt %55 : vector<7x1xf32>
    %57 = vector.broadcast %56 : vector<7x1xf32> to vector<7x32xf32>
    %58 = arith.mulf %53, %57 : vector<7x32xf32>
    %c0_21 = arith.constant 0 : index
    %c0_22 = arith.constant 0 : index
    %59 = vector.load %arg6[%c0_21, %c0_22] : memref<1x32xf32, #tpu.memory_space<vmem>>, vector<1x32xf32>
    %60 = vector.broadcast %59 : vector<1x32xf32> to vector<7x32xf32>
    %61 = arith.mulf %58, %60 : vector<7x32xf32>
    %c0_23 = arith.constant 0 : index
    %c0_24 = arith.constant 0 : index
    %62 = vector.load %arg7[%c0_23, %c0_24] : memref<1x32xf32, #tpu.memory_space<vmem>>, vector<1x32xf32>
    %63 = vector.broadcast %62 : vector<1x32xf32> to vector<7x32xf32>
    %64 = arith.addf %61, %63 : vector<7x32xf32>
    %65 = arith.truncf %64 : vector<7x32xf32> to vector<7x32xbf16>
    %c0_25 = arith.constant 0 : index
    %c0_26 = arith.constant 0 : index
    %66 = vector.load %arg8[%c0_25, %c0_26] : memref<32x32xbf16, #tpu.memory_space<vmem>>, vector<32x32xbf16>
    %cst_27 = arith.constant dense<0.000000e+00> : vector<7x32xf32>
    %67 = tpu.matmul %65, %66, %cst_27 {dimension_numbers = #tpu.dot_dimension_numbers<[1], [0], [0], [1], [0, 0, 1, 1], [], []>} : vector<7x32xbf16>, vector<32x32xbf16>, vector<7x32xf32> -> vector<7x32xf32>
    %c0_28 = arith.constant 0 : index
    %c0_29 = arith.constant 0 : index
    %68 = vector.load %arg9[%c0_28, %c0_29] : memref<1x32xf32, #tpu.memory_space<vmem>>, vector<1x32xf32>
    %69 = vector.broadcast %68 : vector<1x32xf32> to vector<7x32xf32>
    %70 = arith.addf %67, %69 : vector<7x32xf32>
    %cst_30 = arith.constant 0.000000e+00 : f32
    %71 = vector.broadcast %cst_30 : f32 to vector<7x32xf32>
    %72 = arith.maximumf %70, %71 : vector<7x32xf32>
    %73 = arith.truncf %72 : vector<7x32xf32> to vector<7x32xbf16>
    %c0_31 = arith.constant 0 : index
    %c0_32 = arith.constant 0 : index
    %74 = vector.load %arg10[%c0_31, %c0_32] : memref<32x32xbf16, #tpu.memory_space<vmem>>, vector<32x32xbf16>
    %cst_33 = arith.constant dense<0.000000e+00> : vector<7x32xf32>
    %75 = tpu.matmul %73, %74, %cst_33 {dimension_numbers = #tpu.dot_dimension_numbers<[1], [0], [0], [1], [0, 0, 1, 1], [], []>} : vector<7x32xbf16>, vector<32x32xbf16>, vector<7x32xf32> -> vector<7x32xf32>
    %c0_34 = arith.constant 0 : index
    %c0_35 = arith.constant 0 : index
    %76 = vector.load %arg11[%c0_34, %c0_35] : memref<1x32xf32, #tpu.memory_space<vmem>>, vector<1x32xf32>
    %77 = vector.broadcast %76 : vector<1x32xf32> to vector<7x32xf32>
    %78 = arith.addf %75, %77 : vector<7x32xf32>
    %79 = arith.addf %78, %64 : vector<7x32xf32>
    %cst_36 = arith.constant dense<0.000000e+00> : vector<7xf32>
    %80 = vector.multi_reduction <add>, %79, %cst_36 [1] : vector<7x32xf32> to vector<7xf32>
    %81 = vector.shape_cast %80 : vector<7xf32> to vector<7x1xf32>
    %cst_37 = arith.constant 3.200000e+01 : f32
    %82 = vector.broadcast %cst_37 : f32 to vector<7x1xf32>
    %83 = arith.divf %81, %82 : vector<7x1xf32>
    %84 = vector.broadcast %83 : vector<7x1xf32> to vector<7x32xf32>
    %85 = arith.subf %79, %84 : vector<7x32xf32>
    %86 = arith.mulf %85, %85 : vector<7x32xf32>
    %cst_38 = arith.constant dense<0.000000e+00> : vector<7xf32>
    %87 = vector.multi_reduction <add>, %86, %cst_38 [1] : vector<7x32xf32> to vector<7xf32>
    %88 = vector.shape_cast %87 : vector<7xf32> to vector<7x1xf32>
    %cst_39 = arith.constant 3.200000e+01 : f32
    %89 = vector.broadcast %cst_39 : f32 to vector<7x1xf32>
    %90 = arith.divf %88, %89 : vector<7x1xf32>
    %91 = vector.broadcast %83 : vector<7x1xf32> to vector<7x32xf32>
    %92 = arith.subf %79, %91 : vector<7x32xf32>
    %cst_40 = arith.constant 9.99999974E-6 : f32
    %93 = vector.broadcast %cst_40 : f32 to vector<7x1xf32>
    %94 = arith.addf %90, %93 : vector<7x1xf32>
    %95 = math.rsqrt %94 : vector<7x1xf32>
    %96 = vector.broadcast %95 : vector<7x1xf32> to vector<7x32xf32>
    %97 = arith.mulf %92, %96 : vector<7x32xf32>
    %c0_41 = arith.constant 0 : index
    %c0_42 = arith.constant 0 : index
    %98 = vector.load %arg12[%c0_41, %c0_42] : memref<1x32xf32, #tpu.memory_space<vmem>>, vector<1x32xf32>
    %99 = vector.broadcast %98 : vector<1x32xf32> to vector<7x32xf32>
    %100 = arith.mulf %97, %99 : vector<7x32xf32>
    %c0_43 = arith.constant 0 : index
    %c0_44 = arith.constant 0 : index
    %101 = vector.load %arg13[%c0_43, %c0_44] : memref<1x32xf32, #tpu.memory_space<vmem>>, vector<1x32xf32>
    %102 = vector.broadcast %101 : vector<1x32xf32> to vector<7x32xf32>
    %103 = arith.addf %100, %102 : vector<7x32xf32>
    %104 = arith.truncf %103 : vector<7x32xf32> to vector<7x32xbf16>
    %105 = tpu.iota {dimensions = array<i32: 1>} : vector<7x64xi32>
    %c0_45 = arith.constant 0 : index
    %c0_46 = arith.constant 0 : index
    %c0_47 = arith.constant 0 : index
    %106 = vector.load %arg2[%c0_45, %c0_46, %c0_47] : memref<1x7x1xi32, #tpu.memory_space<vmem>>, vector<1x7x1xi32>
    %107 = vector.shape_cast %106 : vector<1x7x1xi32> to vector<7x1xi32>
    %108 = vector.broadcast %107 : vector<7x1xi32> to vector<7x64xi32>
    %109 = arith.cmpi eq, %108, %105 : vector<7x64xi32>
    %110 = arith.extui %109 : vector<7x64xi1> to vector<7x64xi32>
    %111 = arith.sitofp %110 : vector<7x64xi32> to vector<7x64xf32>
    %112 = arith.truncf %111 : vector<7x64xf32> to vector<7x64xbf16>
    %113 = arith.cmpi sle, %14, %13 : vector<7x7xi32>
    %114 = arith.extui %113 : vector<7x7xi1> to vector<7x7xi32>
    %115 = arith.sitofp %114 : vector<7x7xi32> to vector<7x7xf32>
    %116 = arith.truncf %115 : vector<7x7xf32> to vector<7x7xbf16>
    %cst_48 = arith.constant dense<0.000000e+00> : vector<7x64xf32>
    %117 = tpu.matmul %116, %112, %cst_48 {dimension_numbers = #tpu.dot_dimension_numbers<[1], [0], [0], [1], [0, 0, 1, 1], [], []>} : vector<7x7xbf16>, vector<7x64xbf16>, vector<7x64xf32> -> vector<7x64xf32>
    %cst_49 = arith.constant 5.000000e-01 : f32
    %118 = vector.broadcast %cst_49 : f32 to vector<7x64xf32>
    %119 = arith.cmpf ogt, %117, %118 : vector<7x64xf32>
    %c0_i32_50 = arith.constant 0 : i32
    %120 = vector.broadcast %c0_i32_50 : i32 to vector<7x64xi32>
    %121 = arith.cmpi eq, %105, %120 : vector<7x64xi32>
    %122 = arith.ori %119, %121 : vector<7x64xi1>
    %cst_51 = arith.constant -1.000000e+09 : f32
    %cst_52 = arith.constant 0.000000e+00 : f32
    %123 = vector.broadcast %cst_51 : f32 to vector<7x64xf32>
    %124 = vector.broadcast %cst_52 : f32 to vector<7x64xf32>
    %125 = arith.select %122, %123, %124 : vector<7x64xi1>, vector<7x64xf32>
    %c0_53 = arith.constant 0 : index
    %c0_54 = arith.constant 0 : index
    %126 = vector.load %arg15[%c0_53, %c0_54] : memref<1x64xf32, #tpu.memory_space<vmem>>, vector<1x64xf32>
    %127 = vector.broadcast %126 : vector<1x64xf32> to vector<7x64xf32>
    %128 = arith.addf %125, %127 : vector<7x64xf32>
    %129 = arith.subi %13, %14 : vector<7x7xi32>
    %c2_i32 = arith.constant 2 : i32
    %130 = vector.broadcast %c2_i32 : i32 to vector<7x7xi32>
    %131 = arith.cmpi eq, %129, %130 : vector<7x7xi32>
    %132 = arith.extui %131 : vector<7x7xi1> to vector<7x7xi32>
    %133 = arith.sitofp %132 : vector<7x7xi32> to vector<7x7xf32>
    %134 = arith.truncf %133 : vector<7x7xf32> to vector<7x7xbf16>
    %cst_55 = arith.constant dense<0.000000e+00> : vector<7x32xf32>
    %135 = tpu.matmul %134, %104, %cst_55 {dimension_numbers = #tpu.dot_dimension_numbers<[1], [0], [0], [1], [0, 0, 1, 1], [], []>} : vector<7x7xbf16>, vector<7x32xbf16>, vector<7x32xf32> -> vector<7x32xf32>
    %136 = arith.truncf %135 : vector<7x32xf32> to vector<7x32xbf16>
    %c0_56 = arith.constant 0 : index
    %c0_57 = arith.constant 0 : index
    %c0_58 = arith.constant 0 : index
    %137 = vector.load %arg14[%c0_56, %c0_57, %c0_58] : memref<3x32x64xbf16, #tpu.memory_space<vmem>>, vector<1x32x64xbf16>
    %138 = vector.shape_cast %137 : vector<1x32x64xbf16> to vector<32x64xbf16>
    %cst_59 = arith.constant dense<0.000000e+00> : vector<7x64xf32>
    %139 = tpu.matmul %136, %138, %cst_59 {dimension_numbers = #tpu.dot_dimension_numbers<[1], [0], [0], [1], [0, 0, 1, 1], [], []>} : vector<7x32xbf16>, vector<32x64xbf16>, vector<7x64xf32> -> vector<7x64xf32>
    %140 = arith.addf %128, %139 : vector<7x64xf32>
    %141 = arith.subi %13, %14 : vector<7x7xi32>
    %c1_i32 = arith.constant 1 : i32
    %142 = vector.broadcast %c1_i32 : i32 to vector<7x7xi32>
    %143 = arith.cmpi eq, %141, %142 : vector<7x7xi32>
    %144 = arith.extui %143 : vector<7x7xi1> to vector<7x7xi32>
    %145 = arith.sitofp %144 : vector<7x7xi32> to vector<7x7xf32>
    %146 = arith.truncf %145 : vector<7x7xf32> to vector<7x7xbf16>
    %cst_60 = arith.constant dense<0.000000e+00> : vector<7x32xf32>
    %147 = tpu.matmul %146, %104, %cst_60 {dimension_numbers = #tpu.dot_dimension_numbers<[1], [0], [0], [1], [0, 0, 1, 1], [], []>} : vector<7x7xbf16>, vector<7x32xbf16>, vector<7x32xf32> -> vector<7x32xf32>
    %148 = arith.truncf %147 : vector<7x32xf32> to vector<7x32xbf16>
    %c1 = arith.constant 1 : index
    %c0_61 = arith.constant 0 : index
    %c0_62 = arith.constant 0 : index
    %149 = vector.load %arg14[%c1, %c0_61, %c0_62] : memref<3x32x64xbf16, #tpu.memory_space<vmem>>, vector<1x32x64xbf16>
    %150 = vector.shape_cast %149 : vector<1x32x64xbf16> to vector<32x64xbf16>
    %cst_63 = arith.constant dense<0.000000e+00> : vector<7x64xf32>
    %151 = tpu.matmul %148, %150, %cst_63 {dimension_numbers = #tpu.dot_dimension_numbers<[1], [0], [0], [1], [0, 0, 1, 1], [], []>} : vector<7x32xbf16>, vector<32x64xbf16>, vector<7x64xf32> -> vector<7x64xf32>
    %152 = arith.addf %140, %151 : vector<7x64xf32>
    %c2 = arith.constant 2 : index
    %c0_64 = arith.constant 0 : index
    %c0_65 = arith.constant 0 : index
    %153 = vector.load %arg14[%c2, %c0_64, %c0_65] : memref<3x32x64xbf16, #tpu.memory_space<vmem>>, vector<1x32x64xbf16>
    %154 = vector.shape_cast %153 : vector<1x32x64xbf16> to vector<32x64xbf16>
    %cst_66 = arith.constant dense<0.000000e+00> : vector<7x64xf32>
    %155 = tpu.matmul %104, %154, %cst_66 {dimension_numbers = #tpu.dot_dimension_numbers<[1], [0], [0], [1], [0, 0, 1, 1], [], []>} : vector<7x32xbf16>, vector<32x64xbf16>, vector<7x64xf32> -> vector<7x64xf32>
    %156 = arith.addf %152, %155 : vector<7x64xf32>
    %c0_67 = arith.constant 0 : index
    %c0_68 = arith.constant 0 : index
    %c0_69 = arith.constant 0 : index
    %157 = vector.load %arg16[%c0_67, %c0_68, %c0_69] : memref<1x7x64xf32, #tpu.memory_space<vmem>>, vector<1x7x64xf32>
    %158 = vector.shape_cast %157 : vector<1x7x64xf32> to vector<7x64xf32>
    %159 = vector.shape_cast %156 : vector<7x64xf32> to vector<1x7x64xf32>
    tpu.vector_store %arg16[%c0_67, %c0_68, %c0_69], %159 {strides = array<i32>} : memref<1x7x64xf32, #tpu.memory_space<vmem>>, vector<1x7x64xf32>,
    return
  }
  func.func @transform_0(%arg0: i32) -> (i32, i32, i32) {
    %c0_i32 = arith.constant 0 : i32
    %c0_i32_0 = arith.constant 0 : i32
    %c0_i32_1 = arith.constant 0 : i32
    return %arg0, %c0_i32, %c0_i32_0 : i32, i32, i32
  }
  func.func @transform_1(%arg0: i32) -> (i32, i32, i32) {
    %c0_i32 = arith.constant 0 : i32
    %c0_i32_0 = arith.constant 0 : i32
    %c0_i32_1 = arith.constant 0 : i32
    return %arg0, %c0_i32, %c0_i32_0 : i32, i32, i32
  }
  func.func @transform_2(%arg0: i32) -> (i32, i32, i32) {
    %c0_i32 = arith.constant 0 : i32
    %c0_i32_0 = arith.constant 0 : i32
    %c0_i32_1 = arith.constant 0 : i32
    return %arg0, %c0_i32, %c0_i32_0 : i32, i32, i32
  }
  func.func @transform_3(%arg0: i32) -> (i32, i32) {
    %c0_i32 = arith.constant 0 : i32
    %c0_i32_0 = arith.constant 0 : i32
    %c0_i32_1 = arith.constant 0 : i32
    return %c0_i32, %c0_i32_0 : i32, i32
  }
  func.func @transform_4(%arg0: i32) -> (i32, i32) {
    %c0_i32 = arith.constant 0 : i32
    %c0_i32_0 = arith.constant 0 : i32
    %c0_i32_1 = arith.constant 0 : i32
    return %c0_i32, %c0_i32_0 : i32, i32
  }
  func.func @transform_5(%arg0: i32) -> (i32, i32) {
    %c0_i32 = arith.constant 0 : i32
    %c0_i32_0 = arith.constant 0 : i32
    %c0_i32_1 = arith.constant 0 : i32
    return %c0_i32, %c0_i32_0 : i32, i32
  }
  func.func @transform_6(%arg0: i32) -> (i32, i32) {
    %c0_i32 = arith.constant 0 : i32
    %c0_i32_0 = arith.constant 0 : i32
    %c0_i32_1 = arith.constant 0 : i32
    return %c0_i32, %c0_i32_0 : i32, i32
  }
  func.func @transform_7(%arg0: i32) -> (i32, i32) {
    %c0_i32 = arith.constant 0 : i32
    %c0_i32_0 = arith.constant 0 : i32
    %c0_i32_1 = arith.constant 0 : i32
    return %c0_i32, %c0_i32_0 : i32, i32
  }
  func.func @transform_8(%arg0: i32) -> (i32, i32) {
    %c0_i32 = arith.constant 0 : i32
    %c0_i32_0 = arith.constant 0 : i32
    %c0_i32_1 = arith.constant 0 : i32
    return %c0_i32, %c0_i32_0 : i32, i32
  }
  func.func @transform_9(%arg0: i32) -> (i32, i32) {
    %c0_i32 = arith.constant 0 : i32
    %c0_i32_0 = arith.constant 0 : i32
    %c0_i32_1 = arith.constant 0 : i32
    return %c0_i32, %c0_i32_0 : i32, i32
  }
  func.func @transform_10(%arg0: i32) -> (i32, i32) {
    %c0_i32 = arith.constant 0 : i32
    %c0_i32_0 = arith.constant 0 : i32
    %c0_i32_1 = arith.constant 0 : i32
    return %c0_i32, %c0_i32_0 : i32, i32
  }
  func.func @transform_11(%arg0: i32) -> (i32, i32) {
    %c0_i32 = arith.constant 0 : i32
    %c0_i32_0 = arith.constant 0 : i32
    %c0_i32_1 = arith.constant 0 : i32
    return %c0_i32, %c0_i32_0 : i32, i32
  }
  func.func @transform_12(%arg0: i32) -> (i32, i32) {
    %c0_i32 = arith.constant 0 : i32
    %c0_i32_0 = arith.constant 0 : i32
    %c0_i32_1 = arith.constant 0 : i32
    return %c0_i32, %c0_i32_0 : i32, i32
  }
  func.func @transform_13(%arg0: i32) -> (i32, i32, i32) {
    %c0_i32 = arith.constant 0 : i32
    %c0_i32_0 = arith.constant 0 : i32
    %c0_i32_1 = arith.constant 0 : i32
    %c0_i32_2 = arith.constant 0 : i32
    return %c0_i32, %c0_i32_0, %c0_i32_1 : i32, i32, i32
  }
  func.func @transform_14(%arg0: i32) -> (i32, i32) {
    %c0_i32 = arith.constant 0 : i32
    %c0_i32_0 = arith.constant 0 : i32
    %c0_i32_1 = arith.constant 0 : i32
    return %c0_i32, %c0_i32_0 : i32, i32
  }
  func.func @transform_15(%arg0: i32) -> (i32, i32, i32) {
    %c0_i32 = arith.constant 0 : i32
    %c0_i32_0 = arith.constant 0 : i32
    %c0_i32_1 = arith.constant 0 : i32
    return %arg0, %c0_i32, %c0_i32_0 : i32, i32, i32
  }
}

</mosaic_0001>

<bundles_post_ra>
// kernel: tpu_custom_call.1
= control target key start
LH: loop header
LB: loop body
LE: loop exit
PB: predicated region body
PF: predicated region fallthrough
CT: control target
= control target key end

     0   :  { %20 = vsyncpa [#allocation3], 0  ;;  %s2218_s0 = inlined_call_operand.vmem [shape: s32[2,1,7], index: 0, kind: input, shape index: {}]   ;;  %s2219_s1 = inlined_call_operand.vmem [shape: s32[2,7,1], index: 1, kind: input, shape index: {}]   ;;  %s2220_s2 = inlined_call_operand.vmem [shape: f32[2,7,32], index: 2, kind: input, shape index: {}]   ;;  %s2221_s3 = inlined_call_operand.vmem [shape: bf16[32,96], index: 3, kind: input, shape index: {}]   ;;  %s2222_s4 = inlined_call_operand.hbm [shape: bf16[32,32], index: 4, kind: input, shape index: {}]   ;;  %s2223_s5 = inlined_call_operand.vmem [shape: f32[1,32], index: 5, kind: input, shape index: {}]   ;;  %s2224_s6 = inlined_call_operand.vmem [shape: f32[1,32], index: 6, kind: input, shape index: {}]   ;;  %s2225_s7 = inlined_call_operand.hbm [shape: bf16[32,32], index: 7, kind: input, shape index: {}]   ;;  %s2226_s8 = inlined_call_operand.vmem [shape: f32[1,32], index: 8, kind: input, shape index: {}]   ;;  %s2227_s9 = inlined_call_operand.hbm [shape: bf16[32,32], index: 9, kind: input, shape index: {}]   ;;  %s2228_s10 = inlined_call_operand.vmem [shape: f32[1,32], index: 10, kind: input, shape index: {}]   ;;  %s2229_s11 = inlined_call_operand.vmem [shape: f32[1,32], index: 11, kind: input, shape index: {}]   ;;  %s2230_s12 = inlined_call_operand.hbm [shape: f32[1,32], index: 12, kind: input, shape index: {}]   ;;  %s2231_s13 = inlined_call_operand.vmem [shape: bf16[3,32,64], index: 13, kind: input, shape index: {}]   ;;  %s2232_s14 = inlined_call_operand.vmem [shape: f32[1,64], index: 14, kind: input, shape index: {}]   ;;  %s2233_s15 = inlined_call_operand.vmem [shape: f32[2,7,64], index: 15, kind: output, shape index: {}]  }
   0x1   :  { %21 = vsyncpa [#allocation5], 0 }
   0x2   :  { %22 = vsyncpa [#allocation8], 0  ;;  %s1974_s18 = smov 0  }
   0x3 LB: > { %s1980_s19 = sadd.s32 4294967295, %s1880_s18   ;;  %p1500_p0 = scmp.ge.s32.totalorder %s1880_s18, 1  ;;  %s1880_s18 = sphi %s1974_s18, %s28_s18  }
   0x4   : > { %p389_p1 = scmp.lt.s32.totalorder %s1880_s18, 3  ;;  %p1707_p2 = scmp.eq.s32.totalorder %s1980_s19, 0 }
   0x5   : > { %s1882_s21 = smov [#allocation4]   ;;  %s1883_s23 = smov [#allocation2]  }
   0x6   : > { %p1985_p3 = pnand %p1500_p0, %p389_p1  ;;  %s423_s22 = sshll.u32 %s1882_s21, 4  ;;  %s424_s22 = int_to_ptr.vmem [resolvable:$true] %s423_s22 }
   0x7   : > { %s404_s24 = sshll.u32 %s1883_s23, 4  ;;  %s1884_s26 = smov [#allocation6]   ;;  %s1991_s24 = int_to_ptr.vmem [resolvable:$true] %s404_s24 }
   0x8   : > { %p1694_p4 = pneg %p1985_p3  ;;  %s439_s27 = sshll.u32 %s1884_s26, 4  ;;  %s1999_s27 = int_to_ptr.vmem [resolvable:$true] %s439_s27 }
   0x9   : > { %s1885_s28 = smov [#allocation7]   ;;  %s1769_s30 = scalar_lea.vmem %s424_s22, 256 }
   0xa   : > { %p1995_p5 = pnand %p1707_p2, %p1694_p4  ;;  %s2001_s29 = sshll.u32 %s1885_s28, 4  ;;  %s460_s29 = int_to_ptr.vmem [resolvable:$true] %s2001_s29 }
   0xb   : > { %p1770_p7 = scmp.ne.s32.totalorder %s424_s22, %s1769_s30  ;;  %p1777_p10 = scmp.lt.s32.totalorder %s424_s22, %s424_s22 }
   0xc   : > { %p1760_p6 = pneg %p1995_p5  ;;  %p1778_p11 = scmp.lt.s32.totalorder %s1769_s30, %s1769_s30 }
   0xe   : > { %p1772_p8 = pnand %p1770_p7, %p1760_p6  ;;  %p1779_p12 = por %p1778_p11, %p1777_p10 }
  0x10   : > { %p1773_p9 = pneg %p1772_p8 }
  0x12   : > { %p1780_p13 = pnand %p1779_p12, %p1773_p9 }
  0x14   : > { %1783 = shalt.err (!%p1780_p13)
}
  0x15   : > { %s1886_s16 = smov 64   ;;  %s1887_s17 = smov 4  }
  0x16   : > { %1700 = dma.hbm_to_vmem [thread:$0]  (!%p1995_p5), %s2225_s7, 256, %s424_s22, [#allocation5], %s1886_s16, %s1886_s16, %s1887_s17  }
  0x17   : > { %s1795_s26 = scalar_lea.vmem %s1991_s24, 256  ;;  %p1803_p7 = scmp.lt.s32.totalorder %s1991_s24, %s1991_s24 }
  0x18   : > { %p1796_p0 = scmp.ne.s32.totalorder %s1991_s24, %s1795_s26  ;;  %p1804_p8 = scmp.lt.s32.totalorder %s1795_s26, %s1795_s26 }
  0x1a   : > { %p1798_p1 = pnand %p1796_p0, %p1760_p6  ;;  %p1805_p9 = por %p1804_p8, %p1803_p7 }
  0x1c   : > { %p1799_p4 = pneg %p1798_p1 }
  0x1e   : > { %p1806_p10 = pnand %p1805_p9, %p1799_p4 }
  0x20   : > { %1809 = shalt.err (!%p1806_p10)
}
  0x21   : > { %1697 = dma.hbm_to_vmem [thread:$0]  (!%p1995_p5), %s2222_s4, 256, %s1991_s24, [#allocation3], %s1886_s16, %s1886_s16, %s1887_s17  }
  0x22   : > { %s1821_s22 = scalar_lea.vmem %s1999_s27, 256  ;;  %p1829_p0 = scmp.lt.s32.totalorder %s1999_s27, %s1999_s27 }
  0x23   : > { %p1822_p11 = scmp.ne.s32.totalorder %s1999_s27, %s1821_s22  ;;  %p1830_p1 = scmp.lt.s32.totalorder %s1821_s22, %s1821_s22 }
  0x25   : > { %p1824_p12 = pnand %p1822_p11, %p1760_p6  ;;  %p1831_p4 = por %p1830_p1, %p1829_p0 }
  0x27   : > { %p1825_p13 = pneg %p1824_p12 }
  0x29   : > { %p1832_p7 = pnand %p1831_p4, %p1825_p13 }
  0x2b   : > { %1835 = shalt.err (!%p1832_p7)
}
  0x2c   : > { %1703 = dma.hbm_to_vmem [thread:$0]  (!%p1995_p5), %s2227_s9, 256, %s1999_s27, [#allocation5], %s1886_s16, %s1886_s16, %s1887_s17  }
  0x2d   : > { %s1847_s24 = scalar_lea.vmem %s460_s29, 16  ;;  %s1854_s26 = scalar_lea.vmem %s460_s29, 32 }
  0x2e   : > { %p1848_p8 = scmp.ne.s32.totalorder %s460_s29, %s1847_s24  ;;  %p1855_p11 = scmp.lt.s32.totalorder %s460_s29, %s460_s29 }
  0x2f   : > { %p1856_p12 = scmp.lt.s32.totalorder %s1854_s26, %s1847_s24 }
  0x30   : > { %p1850_p9 = pnand %p1848_p8, %p1760_p6 }
  0x31   : > { %p1857_p13 = por %p1856_p12, %p1855_p11 }
  0x32   : > { %p1851_p10 = pneg %p1850_p9 }
  0x34   : > { %p1858_p0 = pnand %p1857_p13, %p1851_p10 }
  0x36   : > { %1861 = shalt.err (!%p1858_p0)
}
  0x37   : > { %1706 = dma.hbm_to_vmem [thread:$0]  (!%p1995_p5), %s2230_s12, 16, %s460_s29, [#allocation8]  }
  0x38   : > { %498 = sbr.rel (%p1985_p3) target bundleno = 2717 (0xa9d), region = 80 }
  0x3d   : > { %1867 = dma.done.wait (%p1707_p2), [#allocation3], 256  }
  0x3e   : > { %1869 = vsyncadd (%p1707_p2), [#allocation3], 4294967040 }
  0x3f   : > { %1871 = dma.done.wait (%p1707_p2), [#allocation5], 512  }
  0x40   : > { %1873 = vsyncadd (%p1707_p2), [#allocation5], 4294966784 }
  0x41   : > { %1875 = dma.done.wait (%p1707_p2), [#allocation8], 16  }
  0x42   : > { %1877 = vsyncadd (%p1707_p2), [#allocation8], 4294967280  ;;  %p563_p3 = scmp.lt.s32.totalorder %s1980_s19, 1  ;;  %v1888_v0 = vmov 0.0   ;;  %vm1889_vm0 = vmmov 0   ;;  %v1736_v1 = vld [vmem:[%s2221_s3 + $0x8] sm:$0xff]   ;;  %v692_v13 = vlaneseq }
  0x43   : > { %1592 = vmatprep.subr.bf16.mxu0 %v1888_v0  ;;  %1596 = vmatprep.mubr.msk.bf16.mxu0 %vm1889_vm0, %v1888_v0  ;;  %v1737_v2 = vld [vmem:[%s2221_s3] sm:$0xff]   ;;  %vm597_vm1 = vcmask 261120   ;;  %s1890_s23 = smov 96   ;;  %v1891_v12 = vmov 0   ;;  %vm707_vm6 = vcmask 55296   ;;  %v1738_v32 = vld [vmem:[#allocation2 + $0x8] sm:$0xff]  }
  0x44   : > { %s2237_s19 = smov (!%p563_p3, %s1980_s19), 1  ;;  %1600 = vmatprep.subr.bf16.mxu1 %v1888_v0  ;;  %1602 = vmatprep.mubr.msk.bf16.mxu1 %vm1889_vm0, %v1888_v0  ;;  %v2103_v15 = vshrl.u32 %v692_v13, 7  ;;  %v2106_v18 = vand.u32 127, %v692_v13  ;;  %vm726_vm7 = vcmask 1042432   ;;  %vm727_vm8 = vcmask 1043456   ;;  %v1739_v42 = vld [vmem:[#allocation2] sm:$0xff]  }
  0x45   : > { %s2073_s20 = sshll.u32 %s2237_s19, 3  ;;  %1593 = vmatpush3.bf16.msra.mxu0 %v1736_v1  ;;  %1735 = vset.pattern.permute.xlu0 %v1891_v12  ;;  %s565_s28 = scalar_lea.vmem %s2218_s0, %s2237_s19  ;;  %v1893_v33 = vmov 65535   ;;  %vm722_vm9 = vcmask 56320   ;;  %vm833_vm10 = vcmask 260096   ;;  %v1740_v59 = vld [vmem:[#allocation4 + $0x8] sm:$0xff]   ;;  %v1741_v60 = vld [vmem:[#allocation4] sm:$0xff]  }
  0x46   : > { %s573_s29 = scalar_lea.vmem %s2220_s2, %s2073_s20  ;;  %1594 = vmatprep.subr.bf16.mxu0 %v1888_v0  ;;  %v696_v14 = vld [vmem:[%s565_s28] sm:$0x1]  ;;  %v702_v16 = vsub.s32 0, %v2103_v15  ;;  %vm698_vm3 = vcmp.gt.s32.totalorder %v2106_v18, %v2103_v15  ;;  %s1892_s19 = smov 64   ;;  %v728_v34 = vsel %vm726_vm7, 4294967295, %v1893_v33  ;;  %vm1038_vm13 = vcmp.le.s32.totalorder %v2106_v18, %v2103_v15 }
  0x47   : > { %v2085_v3 = vld [vmem:[%s573_s29] sm:$0x7f]  ;;  %vm697_vm2 = vcmp.eq.s32.totalorder %v696_v14, 0  ;;  %v2111_v36 = vsel %vm727_vm8, %v728_v34, 0  ;;  %s569_s26 = scalar_lea.vmem %s2219_s1, %s2073_s20  ;;  %s577_s29 = scalar_lea.vmem %s2233_s15, %s2073_s20 }
  0x48   : > { %v580_v4 = vpack.c.bf16 %v2085_v3, %v2085_v3  ;;  %v699_v17 = vsel %vm697_vm2, 1, %v1891_v12  ;;  %v1030_v33 = vld [vmem:[%s569_s26] sm:$0x7f] }
  0x49   : > { %1595 = vmatpush3.bf16.msra.mxu0 %v1737_v2  ;;  %v703_v19 = vrot.slane %v699_v17, %v702_v16  ;;  %v1522_v2 = vld [vmem:[%s2223_s5] ss:$0 sm:$0xff] }
  0x4a   : > { %1606 = vmatprep.subr.bf16.mxu0 %v1888_v0 }
  0x4b   : > { %vm704_vm4 = vcmp.eq.s32.totalorder %v703_v19, 1 }
  0x4c   : > { %1597 = vmatmul.mubr.msk.bf16.vlgmr.msra.gmra.mxu0 %vm597_vm1, %v580_v4  ;;  %vm705_vm5 = vmor %vm698_vm3, %vm704_vm4  ;;  %v1523_v4 = vld [vmem:[%s2224_s6] ss:$0 sm:$0xff] }
  0x4d   : > { %1608 = vmatprep.mubr.msk.bf16.mxu0 %vm1889_vm0, %v1888_v0 }
 0x10c   : > { %v635_v5 = vpop.f32.mrf.mxu0 }
 0x10d   : > { %v641_v6 = vpack.c.bf16 %v635_v5, %v635_v5 }
 0x10e   : > { %v1598_v7 = vpop.f32.mrf.mxu0 }
 0x10f   : > { %643 = vrot.lane.b32.xlu0 %v641_v6, %s1890_s23 }
 0x110   : > { %v638_v8 = vpop.f32.mrf.mxu0 }
 0x111   : > { %v1742_v8 = vld [vmem:[#allocation6 + $0x8] sm:$0xff]  }
 0x112   : > { %v1599_v9 = vpop.f32.mrf.mxu0 }
 0x113   : > { %v1743_v9 = vld [vmem:[#allocation6] sm:$0xff]  }
 0x181   : > { %v644_v10 = vpop.permute.xlu0 %643 }
 0x182   : > { %v649_v11 = vsel %vm597_vm1, %v644_v10, 0  ;;  %v1524_v10 = vld [vmem:[%s2226_s8] ss:$0 sm:$0xff] }
 0x183   : > { %1601 = vmatpush3.bf16.xpose.msra.mxu1 %v649_v11 }
 0x184   : > { %1612 = vmatprep.subr.bf16.mxu1 %v1888_v0 }
 0x18a   : > { %1603 = vmatmul.mubr.msk.bf16.vlgmr.msra.gmra.mxu1 %vm597_vm1, %v641_v6 }
 0x18b   : > { %1616 = vmatprep.mubr.msk.bf16.mxu1 %vm1889_vm0, %v1888_v0  ;;  %1613 = vmatpush3.bf16.msra.mxu1 %v1738_v32 }
 0x18c   : > { %1614 = vmatprep.subr.bf16.mxu1 %v1888_v0 }
 0x18f   : > { %1615 = vmatpush3.bf16.msra.mxu1 %v1739_v42  ;;  %v1533_v42 = vld [vmem:[#allocation7] ss:$0 sm:$0xff] }
 0x190   : > { %1628 = vmatprep.subr.bf16.mxu1 %v1888_v0 }
 0x24a   : > { %v685_v20 = vpop.f32.mrf.mxu1 }
 0x24b   : > { %v691_v21 = vmul.f32 0.17677669, %v685_v20  ;;  %v1528_v20 = vld [vmem:[%s2228_s10] ss:$0 sm:$0xff] }
 0x24c   : > { %v1604_v22 = vpop.f32.mrf.mxu1 }
 0x24d   : > { %v706_v23 = vsel %vm705_vm5, -1e+09, %v691_v21 }
 0x24e   : > { %v688_v24 = vpop.f32.mrf.mxu1  ;;  %v708_v25 = vsel %vm707_vm6, %v706_v23, -inf }
 0x24f   : > { %709 = vmax.xlane.f32.xlu0 %v708_v25 }
 0x250   : > { %v1605_v26 = vpop.f32.mrf.mxu1 }
 0x2d8   : > { %v710_v27 = vpop.xlane.xlu0 %709 }
 0x2d9   : > { %v711_v28 = vsub.f32 %v706_v23, %v710_v27 }
 0x2db   : > { %v712_v29 = vmul.f32 1.442695, %v711_v28 }
 0x2dd   : > { %1750 = vpow2.f32 %v712_v29 }
 0x2ea   : > { %v1751_v30 = vpop.eup %1750 }
 0x2eb   : > { %v714_v31 = vsel %vm707_vm6, %v1751_v30, 0.0 }
 0x2ec   : > { %715 = vadd.xlane.f32.xlu1 %v714_v31 }
 0x2fd   : > { %720 = vrot.lane.b32.xlu1 %v641_v6, %s1892_s19 }
 0x375   : > { %v716_v35 = vpop.xlane.xlu1 %715 }
 0x376   : > { %1752 = vrcp.f32 %v716_v35 }
 0x379   : > { %v721_v37 = vpop.permute.xlu1 %720 }
 0x37a   : > { %v731_v38 = vand.u32 %v2111_v36, %v721_v37 }
 0x37c   : > { %1607 = vmatpush3.bf16.msra.mxu0 %v731_v38 }
 0x37d   : > { %1620 = vmatprep.subr.bf16.mxu0 %v1888_v0 }
 0x383   : > { %v1753_v39 = vpop.eup %1752 }
 0x384   : > { %v718_v40 = vmul.f32 %v1753_v39, %v1751_v30  ;;  %v1532_v39 = vld [vmem:[%s2229_s11] ss:$0 sm:$0xff] }
 0x386   : > { %v719_v41 = vpack.c.bf16 %v718_v40, %v718_v40  ;;  %v1100_v40 = vsub.s32 %v2103_v15, %v2106_v18  ;;  %v1747_v15 = vld [vmem:[%s2231_s13] sm:$0xff]  }
 0x388   : > { %1609 = vmatmul.mubr.msk.bf16.vlgmr.msra.gmra.mxu0 %vm722_vm9, %v719_v41  ;;  %vm1101_vm11 = vcmp.eq.s32.totalorder %v1100_v40, 2  ;;  %vm1212_vm12 = vcmp.eq.s32.totalorder %v1100_v40, 1 }
 0x389   : > { %1624 = vmatprep.mubr.msk.bf16.mxu0 %vm1889_vm0, %v1888_v0  ;;  %1621 = vmatpush3.bf16.msra.mxu0 %v1740_v59  ;;  %v1746_v59 = vld [vmem:[%s2231_s13 + $0x8] sm:$0xff]  }
 0x38a   : > { %1622 = vmatprep.subr.bf16.mxu0 %v1888_v0 }
 0x38d   : > { %1623 = vmatpush3.bf16.msra.mxu0 %v1741_v60  ;;  %v1748_v60 = vld [vmem:[%s2231_s13 + $0x18] sm:$0xff]  }
 0x38e   : > { %1636 = vmatprep.subr.bf16.mxu0 %v1888_v0 }
 0x448   : > { %v767_v43 = vpop.f32.mrf.mxu0 }
 0x449   : > { %v773_v44 = vpack.c.bf16 %v767_v43, %v767_v43 }
 0x44a   : > { %v1610_v45 = vpop.f32.mrf.mxu0 }
 0x44b   : > { %1617 = vmatmul.mubr.msk.bf16.vlgmr.msra.gmra.mxu1 %vm597_vm1, %v773_v44 }
 0x44c   : > { %v770_v46 = vpop.f32.mrf.mxu0  ;;  %1632 = vmatprep.mubr.msk.bf16.mxu1 %vm1889_vm0, %v1888_v0  ;;  %1629 = vmatpush3.bf16.msra.mxu1 %v1742_v8 }
 0x44d   : > { %1630 = vmatprep.subr.bf16.mxu1 %v1888_v0  ;;  %v1538_v46 = vsel %vm1101_vm11, 1.0, %v1888_v0 }
 0x44e   : > { %v1611_v47 = vpop.f32.mrf.mxu0 }
 0x450   : > { %1631 = vmatpush3.bf16.msra.mxu1 %v1743_v9 }
 0x451   : > { %1642 = vmatprep.subr.bf16.mxu1 %v1888_v0 }
 0x50b   : > { %v827_v48 = vpop.f32.mrf.mxu1 }
 0x50c   : > { %v828_v49 = vadd.f32 %v827_v48, %v2085_v3  ;;  %v1104_v48 = vpack.c.bf16 %v1538_v46, %v1538_v46 }
 0x50d   : > { %v1618_v50 = vpop.f32.mrf.mxu1 }
 0x50e   : > { %v834_v51 = vsel %vm833_vm10, %v828_v49, 0.0 }
 0x50f   : > { %835 = vadd.xlane.f32.xlu1 %v834_v51  ;;  %v830_v52 = vpop.f32.mrf.mxu1  ;;  %v1744_v51 = vld [vmem:[%s2231_s13 + $0x28] sm:$0xff]  }
 0x510   : > { %v1745_v52 = vld [vmem:[%s2231_s13 + $0x20] sm:$0xff]  }
 0x511   : > { %v1619_v53 = vpop.f32.mrf.mxu1 }
 0x598   : > { %v836_v54 = vpop.xlane.xlu1 %835 }
 0x599   : > { %v838_v55 = vmul.f32 0.03125, %v836_v54 }
 0x59b   : > { %v839_v56 = vsub.f32 %v828_v49, %v838_v55  ;;  %v1543_v49 = vsel %vm1212_vm12, 1.0, %v1888_v0 }
 0x59c   : > { %v1215_v50 = vpack.c.bf16 %v1543_v49, %v1543_v49 }
 0x59d   : > { %v840_v57 = vmul.f32 %v839_v56, %v839_v56 }
 0x59f   : > { %v841_v58 = vsel %vm833_vm10, %v840_v57, 0.0 }
 0x5a0   : > { %842 = vadd.xlane.f32.xlu0 %v841_v58 }
 0x629   : > { %v843_v61 = vpop.xlane.xlu0 %842 }
 0x62a   : > { %v844_v62 = vmul.f32 0.03125, %v843_v61 }
 0x62c   : > { %v845_v63 = vadd.f32 1e-05, %v844_v62 }
 0x62e   : > { %1754 = vrsqrt.f32 %v845_v63 }
 0x63b   : > { %v1755_v1 = vpop.eup %1754 }
 0x63c   : > { %v847_v3 = vmul.f32 %v1755_v1, %v839_v56  ;;  %v1535_v56 = vsel %vm1038_vm13, 1.0, %v1888_v0  ;;  %v1749_v1 = vld [vmem:[%s2231_s13 + $0x10] sm:$0xff]  }
 0x63d   : > { %v1041_v58 = vpack.c.bf16 %v1535_v56, %v1535_v56 }
 0x63e   : > { %v855_v5 = vmul.f32 %v1522_v2, %v847_v3 }
 0x640   : > { %v863_v6 = vadd.f32 %v1523_v4, %v855_v5 }
 0x642   : > { %v864_v7 = vpack.c.bf16 %v863_v6, %v863_v6 }
 0x644   : > { %1625 = vmatmul.mubr.msk.bf16.vlgmr.msra.gmra.mxu0 %vm597_vm1, %v864_v7 }
 0x645   : > { %1638 = vmatprep.mubr.msk.bf16.mxu0 %vm1889_vm0, %v1888_v0 }
 0x704   : > { %v925_v11 = vpop.f32.mrf.mxu0 }
 0x705   : > { %v926_v12 = vadd.f32 %v1524_v10, %v925_v11 }
 0x706   : > { %v1626_v13 = vpop.f32.mrf.mxu0 }
 0x707   : > { %v931_v14 = vmax.f32 %v926_v12, 0.0 }
 0x708   : > { %v928_v16 = vpop.f32.mrf.mxu0 }
 0x709   : > { %v932_v17 = vpack.c.bf16 %v931_v14, %v931_v14 }
 0x70a   : > { %v1627_v19 = vpop.f32.mrf.mxu0 }
 0x70b   : > { %1633 = vmatmul.mubr.msk.bf16.vlgmr.msra.gmra.mxu1 %vm597_vm1, %v932_v17 }
 0x70c   : > { %1644 = vmatprep.mubr.msk.bf16.mxu1 %vm1889_vm0, %v1888_v0 }
 0x7cb   : > { %v993_v21 = vpop.f32.mrf.mxu1 }
 0x7cc   : > { %v994_v22 = vadd.f32 %v1528_v20, %v993_v21  ;;  %v1537_v20 = vld [vmem:[%s2232_s14] ss:$0 sm:$0xff] }
 0x7cd   : > { %v1634_v23 = vpop.f32.mrf.mxu1 }
 0x7ce   : > { %v999_v24 = vadd.f32 %v994_v22, %v863_v6 }
 0x7cf   : > { %v996_v25 = vpop.f32.mrf.mxu1 }
 0x7d0   : > { %v1000_v26 = vsel %vm833_vm10, %v999_v24, 0.0 }
 0x7d1   : > { %1001 = vadd.xlane.f32.xlu0 %v1000_v26  ;;  %v1635_v27 = vpop.f32.mrf.mxu1 }
 0x85a   : > { %v1002_v28 = vpop.xlane.xlu0 %1001 }
 0x85b   : > { %v1003_v29 = vmul.f32 0.03125, %v1002_v28 }
 0x85d   : > { %v1004_v30 = vsub.f32 %v999_v24, %v1003_v29 }
 0x85f   : > { %v1005_v31 = vmul.f32 %v1004_v30, %v1004_v30 }
 0x861   : > { %v1006_v32 = vsel %vm833_vm10, %v1005_v31, 0.0 }
 0x862   : > { %1007 = vadd.xlane.f32.xlu0 %v1006_v32 }
 0x878   : > { %1032 = vperm.xlu0 %1735, %v1030_v33  }
 0x8eb   : > { %v1008_v34 = vpop.xlane.xlu0 %1007 }
 0x8ec   : > { %v1009_v35 = vmul.f32 0.03125, %v1008_v34 }
 0x8ee   : > { %v1010_v37 = vadd.f32 1e-05, %v1009_v35 }
 0x8f0   : > { %1756 = vrsqrt.f32 %v1010_v37 }
 0x8f3   : > { %v1033_v53 = vpop.permute.xlu0 %1032 }
 0x8f4   : > { %vm1034_vm14 = vcmp.eq.s32.totalorder %v1033_v53, %v2106_v18 }
 0x8f5   : > { %v1534_v54 = vsel %vm1034_vm14, 1.0, %v1888_v0 }
 0x8f6   : > { %v1037_v55 = vpack.c.bf16 %v1534_v54, %v1534_v54 }
 0x8f8   : > { %v1046_v57 = vand.u32 %v1037_v55, %v2111_v36 }
 0x8fa   : > { %1637 = vmatpush3.bf16.msra.mxu0 %v1046_v57 }
 0x8fb   : > { %1648 = vmatprep.subr.bf16.mxu0 %v1888_v0 }
 0x8fd   : > { %v1757_v38 = vpop.eup %1756  ;;  %1639 = vmatmul.mubr.msk.bf16.vlgmr.msra.gmra.mxu0 %vm722_vm9, %v1041_v58 }
 0x8fe   : > { %v1012_v41 = vmul.f32 %v1757_v38, %v1004_v30  ;;  %1649 = vmatpush3.bf16.msra.mxu0 %v1746_v59  ;;  %1652 = vmatprep.mubr.msk.bf16.mxu0 %vm1889_vm0, %v1888_v0 }
 0x8ff   : > { %1650 = vmatprep.subr.bf16.mxu0 %v1888_v0 }
 0x900   : > { %v1020_v43 = vmul.f32 %v1532_v39, %v1012_v41 }
 0x902   : > { %v1028_v44 = vadd.f32 %v1533_v42, %v1020_v43  ;;  %1651 = vmatpush3.bf16.msra.mxu0 %v1747_v15 }
 0x903   : > { %1662 = vmatprep.subr.bf16.mxu0 %v1888_v0 }
 0x904   : > { %v1029_v45 = vpack.c.bf16 %v1028_v44, %v1028_v44 }
 0x906   : > { %v1109_v47 = vand.u32 %v1029_v45, %v2111_v36 }
 0x908   : > { %1643 = vmatpush3.bf16.msra.mxu1 %v1109_v47 }
 0x909   : > { %1656 = vmatprep.subr.bf16.mxu1 %v1888_v0 }
 0x90b   : > { %1645 = vmatmul.mubr.msk.bf16.vlgmr.msra.gmra.mxu1 %vm722_vm9, %v1104_v48 }
 0x90c   : > { %1657 = vmatpush3.bf16.msra.mxu1 %v1109_v47  ;;  %1658 = vmatprep.mubr.msk.bf16.mxu1 %vm1889_vm0, %v1888_v0 }
 0x90d   : > { %1670 = vmatprep.subr.bf16.mxu1 %v1888_v0 }
 0x913   : > { %1659 = vmatmul.mubr.msk.bf16.vlgmr.msra.gmra.mxu1 %vm722_vm9, %v1215_v50 }
 0x914   : > { %1671 = vmatpush3.bf16.msra.mxu1 %v1744_v51  ;;  %1674 = vmatprep.mubr.msk.bf16.mxu1 %vm1889_vm0, %v1888_v0 }
 0x915   : > { %1672 = vmatprep.subr.bf16.mxu1 %v1888_v0 }
 0x918   : > { %1673 = vmatpush3.bf16.msra.mxu1 %v1745_v52 }
 0x91b   : > { %1675 = vmatmul.mubr.msk.bf16.vlgmr.msra.gmra.mxu1 %vm597_vm1, %v1029_v45 }
 0x9bd   : > { %v1082_v12 = vpop.f32.mrf.mxu0 }
 0x9be   : > { %vm1088_vm15 = vcmp.gt.f32.partialorder %v1082_v12, 0.5 }
 0x9bf   : > { %v1640_v13 = vpop.f32.mrf.mxu0 }
 0x9c1   : > { %v1085_v14 = vpop.f32.mrf.mxu0 }
 0x9c3   : > { %v1641_v16 = vpop.f32.mrf.mxu0 }
 0x9cb   : > { %v1145_v36 = vpop.f32.mrf.mxu1 }
 0x9cc   : > { %v1151_v61 = vpack.c.bf16 %v1145_v36, %v1145_v36 }
 0x9cd   : > { %v1646_v62 = vpop.f32.mrf.mxu1 }
 0x9ce   : > { %1653 = vmatmul.mubr.msk.bf16.vlgmr.msra.gmra.mxu0 %vm597_vm1, %v1151_v61 }
 0x9cf   : > { %v1148_v63 = vpop.f32.mrf.mxu1  ;;  %1663 = vmatpush3.bf16.msra.mxu0 %v1748_v60  ;;  %1666 = vmatprep.mubr.msk.bf16.mxu0 %vm1889_vm0, %v1888_v0  ;;  %vm1089_vm0 = vcmp.eq.s32.totalorder %v2106_v18, 0 }
 0x9d0   : > { %1664 = vmatprep.subr.bf16.mxu0 %v1888_v0  ;;  %vm1090_vm2 = vmor %vm1088_vm15, %vm1089_vm0 }
 0x9d1   : > { %v1647_v2 = vpop.f32.mrf.mxu1  ;;  %v1091_v19 = vsel %vm1090_vm2, -1e+09, %v1888_v0 }
 0x9d2   : > { %v1099_v23 = vadd.f32 %v1537_v20, %v1091_v19 }
 0x9d3   : > { %v1253_v3 = vpop.f32.mrf.mxu1  ;;  %1665 = vmatpush3.bf16.msra.mxu0 %v1749_v1 }
 0x9d4   : > { %v1259_v4 = vpack.c.bf16 %v1253_v3, %v1253_v3 }
 0x9d5   : > { %v1660_v5 = vpop.f32.mrf.mxu1 }
 0x9d6   : > { %1667 = vmatmul.mubr.msk.bf16.vlgmr.msra.gmra.mxu0 %vm597_vm1, %v1259_v4  ;;  %vm1381_vm1 = vcmask 522240  }
 0x9d7   : > { %v1256_v6 = vpop.f32.mrf.mxu1 }
 0x9d9   : > { %v1661_v7 = vpop.f32.mrf.mxu1 }
 0x9db   : > { %v1374_v8 = vpop.f32.mrf.mxu1 }
 0x9dd   : > { %v1676_v9 = vpop.f32.mrf.mxu1 }
 0x9df   : > { %v1377_v10 = vpop.f32.mrf.mxu1 }
 0x9e1   : > { %v1677_v11 = vpop.f32.mrf.mxu1 }
 0xa8e   : > { %v1205_v17 = vpop.f32.mrf.mxu0 }
 0xa8f   : > { %v1211_v25 = vadd.f32 %v1205_v17, %v1099_v23 }
 0xa90   : > { %v1654_v21 = vpop.f32.mrf.mxu0 }
 0xa92   : > { %v1208_v22 = vpop.f32.mrf.mxu0 }
 0xa94   : > { %v1655_v24 = vpop.f32.mrf.mxu0 }
 0xa96   : > { %v1314_v26 = vpop.f32.mrf.mxu0 }
 0xa97   : > { %v1320_v27 = vadd.f32 %v1314_v26, %v1211_v25 }
 0xa98   : > { %v1668_v18 = vpop.f32.mrf.mxu0 }
 0xa99   : > { %v1380_v28 = vadd.f32 %v1374_v8, %v1320_v27 }
 0xa9a   : > { %v1317_v29 = vpop.f32.mrf.mxu0 }
 0xa9b   : > { %1382 = vst.msk [vmem:[%s577_s29] sm:$0x7f] %vm1381_vm1, %v1380_v28 }
 0xa9c   : > { %v1669_v0 = vpop.f32.mrf.mxu0 }
 0xa9d PF: > { %s28_s18 = sadd.s32 1, %s1880_s18  }
 0xa9e   : > { %p25_p2 = scmp.ge.s32.totalorder %s28_s18, 4  }
 0xaa0   :  { %27 = sbr.rel (!%p25_p2) target bundleno = 3 (0x3), region = 135 }
 0xaa5   :  { %1402 = vsyncpa [#allocation3], 1 }
 0xaa6   :  { %1404 = vsyncpa [#allocation3 + $0x1], 1 }
 0xaa7   :  { %1405 = vsyncpa [#allocation5], 1 }
 0xaa8   :  { %1406 = vsyncpa [#allocation8], 1 }

</bundles_post_ra>
